<compile_context>
chip_gen: v7x
topology: tpu7x:2x2x1
jax: 0.10.0
libtpu: 0.0.40
codegen_flags: <defaults>
</compile_context>

<pallas_src>
import functools

import jax
import jax.numpy as jnp
from jax.experimental import pallas as pl
from jax.experimental.pallas import tpu as pltpu

LANE = 128        # vreg lane width
BATCH_ALIGN = 16  # batch tile alignment (covers f32 8-sublane and bf16 16-row packing)


def _round_up(n, m):
    return ((n + m - 1) // m) * m


def _cdiv(a, b):
    return -(-a // b)


# ---------------------------------------------------------------------------
# Kernel body
# ---------------------------------------------------------------------------
def actor_kernel(x_ref, w1_ref, b1_ref, w2_ref, b2_ref, w3_ref, b3_ref, o_ref):
    # fc1 -> relu. bf16 operands on the MXU, f32 accumulation. K = num_state is
    # left unpadded (the MXU masks the short contraction; no extra pass needed).
    h1 = jnp.dot(x_ref[...], w1_ref[...], preferred_element_type=jnp.float32)
    h1 = jnp.maximum(h1 + b1_ref[...], 0.0)
    # fc2 -> relu. Padded hidden lanes carry exact zeros (zero weight cols + zero bias).
    h2 = jnp.dot(h1.astype(jnp.bfloat16), w2_ref[...],
                 preferred_element_type=jnp.float32)
    h2 = jnp.maximum(h2 + b2_ref[...], 0.0)
    # Action head -> tanh. Output kept at the true num_action width (narrow masked
    # store, but 16x fewer HBM writeback bytes than a 128-lane padded output).
    a = jnp.dot(h2.astype(jnp.bfloat16), w3_ref[...],
                preferred_element_type=jnp.float32)
    # Bias add / ReLU / tanh stay f32 (v5e VPU/EUP have no bf16).
    o_ref[...] = jnp.tanh(a + b3_ref[...]).astype(o_ref.dtype)


# ---------------------------------------------------------------------------
# One-time parameter preparation (init time, NOT in the per-step forward path)
# ---------------------------------------------------------------------------
def prepare_actor_params(w1, b1, w2, b2, w3, b3):
    """Pad hidden dims to 128 lanes and cast matmul operands to bf16, once.

    Zero padding is exact (relu(0) = 0, padded weight rows/cols are zero);
    biases stay f32.  Returns (w1p, b1p, w2p, b2p, w3p, b3p).
    """
    num_state, num_hidden = w1.shape
    num_action = w3.shape[1]
    H = _round_up(num_hidden, LANE)

    f32, bf16 = jnp.float32, jnp.bfloat16
    w1p = (jnp.zeros((num_state, H), f32)
           .at[:, :num_hidden].set(jnp.asarray(w1, f32)).astype(bf16))
    w2p = (jnp.zeros((H, H), f32)
           .at[:num_hidden, :num_hidden].set(jnp.asarray(w2, f32)).astype(bf16))
    w3p = (jnp.zeros((H, num_action), f32)
           .at[:num_hidden, :].set(jnp.asarray(w3, f32)).astype(bf16))
    b1p = jnp.zeros((1, H), f32).at[:, :num_hidden].set(jnp.asarray(b1, f32).reshape(1, -1))
    b2p = jnp.zeros((1, H), f32).at[:, :num_hidden].set(jnp.asarray(b2, f32).reshape(1, -1))
    b3p = jnp.asarray(b3, f32).reshape(1, num_action)
    return (w1p, b1p, w2p, b2p, w3p, b3p)


# ---------------------------------------------------------------------------
# Generation-aware batch tiling
# ---------------------------------------------------------------------------
def _num_tensorcores():
    """Best-effort TensorCore count of device 0 (v5e/v6e: 1; v7x: 2)."""
    try:
        dev = jax.devices()[0]
        if dev.platform != "tpu":
            return 1
        return max(int(getattr(dev, "num_cores", 1) or 1), 1)
    except Exception:
        return 1


def _choose_batch_tiling(batch, num_tc, min_rows_per_core=1024, max_rows_per_step=8192):
    """Pick (block_b, grid_steps).

    grid=(1,) unless (a) splitting across >=2 TensorCores pays for the
    ~0.35-0.6us per-step overhead (large batch on a multi-TC chip), or
    (b) a single tile would exceed max_rows_per_step.  On single-TC v5e/v6e
    extra grid steps are a serial loop, so a single full-extent tile is used.
    """
    steps = 1
    if num_tc > 1 and batch >= num_tc * min_rows_per_core:
        steps = num_tc
    steps = max(steps, _cdiv(batch, max_rows_per_step))
    if steps == 1:
        # Single full-extent tile: no batch padding, no sublane constraint.
        return batch, 1
    bb = _round_up(_cdiv(batch, steps), BATCH_ALIGN)
    return bb, _cdiv(batch, bb)


# ---------------------------------------------------------------------------
# Forward pass
# ---------------------------------------------------------------------------
@functools.partial(jax.jit, static_argnames=("block_b", "grid_steps"))
def _actor_forward_impl(x, w1p, b1p, w2p, b2p, w3p, b3p, *, block_b, grid_steps):
    batch, num_state = x.shape
    H = w1p.shape[1]
    num_action = w3p.shape[1]
    padded_batch = block_b * grid_steps

    # Per-call data prep is only a bf16 cast (+ batch pad when B % block_b != 0);
    # all weight padding / casting happened once in prepare_actor_params().
    xp = x.astype(jnp.bfloat16)
    if padded_batch != batch:
        xp = jnp.pad(xp, ((0, padded_batch - batch), (0, 0)))

    # Advisory cost so XLA schedules/overlaps this tiny custom call correctly.
    flops = 2 * padded_batch * (num_state * H + H * H + H * num_action)
    bytes_accessed = (
        padded_batch * num_state * 2                        # x (bf16)
        + (num_state * H + H * H + H * num_action) * 2      # weights (bf16)
        + (2 * H + num_action) * 4                          # biases (f32)
        + padded_batch * num_action * 4                     # output (f32)
    )
    cost = pl.CostEstimate(flops=flops,
                           transcendentals=padded_batch * num_action,
                           bytes_accessed=bytes_accessed)

    # Weights/biases use a constant block index (resident across grid steps) and a
    # single pipeline buffer (the default second buffer is dead VMEM for them).
    # VMEM budget check (v7x: 64 MiB physical, 32 MiB scoped default):
    #   resident ~= 2B*(S*H + H*H + H*A) + 2*block_b*(S*2 + A*4) + f32 biases;
    # at these dims that is well under 1 MiB.  If num_hidden grows ~16x, raise
    # vmem_limit_bytes via CompilerParams and shrink block_b before tiling H.
    resident = dict(pipeline_mode=pl.Buffered(1))
    in_specs = [
        pl.BlockSpec((block_b, num_state), lambda i: (i, 0)),        # x tile
        pl.BlockSpec((num_state, H), lambda i: (0, 0), **resident),  # W1
        pl.BlockSpec((1, H), lambda i: (0, 0), **resident),          # b1
        pl.BlockSpec((H, H), lambda i: (0, 0), **resident),          # W2
        pl.BlockSpec((1, H), lambda i: (0, 0), **resident),          # b2
        pl.BlockSpec((H, num_action), lambda i: (0, 0), **resident), # W3
        pl.BlockSpec((1, num_action), lambda i: (0, 0), **resident), # b3
    ]
    out_specs = pl.BlockSpec((block_b, num_action), lambda i: (i, 0))

    out = pl.pallas_call(
        actor_kernel,
        out_shape=jax.ShapeDtypeStruct((padded_batch, num_action), jnp.float32),
        grid_spec=pltpu.PrefetchScalarGridSpec(
            num_scalar_prefetch=0,
            grid=(grid_steps,),
            in_specs=in_specs,
            out_specs=out_specs,
        ),
        compiler_params=pltpu.CompilerParams(
            # Independent batch axis: shards across both TensorCores on v7x
            # whenever grid_steps >= 2; single step on single-TC v5e/v6e.
            dimension_semantics=("parallel",),
        ),
        cost_estimate=cost,
    )(xp, w1p, b1p, w2p, b2p, w3p, b3p)

    if padded_batch != batch:
        out = out[:batch]
    return out


def actor_deterministic_forward(x, params, *, grid_steps=None,
                                min_rows_per_core=1024, max_rows_per_step=8192):
    """tanh(relu(relu(x@W1+b1)@W2+b2)@W3+b3) with params from prepare_actor_params()."""
    # TODO(synk): the numpy->tensor conversion and torch.isnan input assert from the
    # PyTorch forward() are host-side checks and are not reproduced inside the kernel.
    w1p, b1p, w2p, b2p, w3p, b3p = params
    batch = x.shape[0]
    if grid_steps is None:
        block_b, steps = _choose_batch_tiling(batch, _num_tensorcores(),
                                              min_rows_per_core, max_rows_per_step)
    else:
        steps = max(int(grid_steps), 1)
        if steps == 1:
            block_b = batch
        else:
            block_b = _round_up(_cdiv(batch, steps), BATCH_ALIGN)
    return _actor_forward_impl(x, w1p, b1p, w2p, b2p, w3p, b3p,
                               block_b=block_b, grid_steps=steps)


# ---------------------------------------------------------------------------
# Init + reference + smoke test
# ---------------------------------------------------------------------------
def init_linear_params(key, fan_in, fan_out):
    """Mimics PyTorch nn.Linear default init: U(-1/sqrt(fan_in), 1/sqrt(fan_in))."""
    kw, kb = jax.random.split(key)
    bound = 1.0 / jnp.sqrt(jnp.float32(fan_in))
    # Stored transposed relative to PyTorch: (in_features, out_features) for x @ W.
    w = jax.random.uniform(kw, (fan_in, fan_out), jnp.float32, -bound, bound)
    b = jax.random.uniform(kb, (fan_out,), jnp.float32, -bound, bound)
    return w, b


def reference_forward(x, w1, b1, w2, b2, w3, b3):
    """Pure-JAX reference using the same bf16-operand / f32-accumulate numerics."""
    bf16 = jnp.bfloat16
    h = jnp.dot(x.astype(bf16), w1.astype(bf16), preferred_element_type=jnp.float32) + b1
    h = jnp.maximum(h, 0.0)
    h = jnp.dot(h.astype(bf16), w2.astype(bf16), preferred_element_type=jnp.float32) + b2
    h = jnp.maximum(h, 0.0)
    a = jnp.dot(h.astype(bf16), w3.astype(bf16), preferred_element_type=jnp.float32) + b3
    return jnp.tanh(a)


if __name__ == "__main__":
    # Shapes consistent with the module's __init__ (num_state -> num_hidden -> num_hidden -> num_action).
    batch = 256
    num_state = 16
    num_hidden = 32
    num_action = 8

    key = jax.random.PRNGKey(0)
    kx, k1, k2, k3 = jax.random.split(key, 4)

    x = jax.random.normal(kx, (batch, num_state), jnp.float32)
    w1, b1 = init_linear_params(k1, num_state, num_hidden)
    w2, b2 = init_linear_params(k2, num_hidden, num_hidden)
    w3, b3 = init_linear_params(k3, num_hidden, num_action)

    # One-time parameter prep (outside the per-call path).
    params = jax.block_until_ready(prepare_actor_params(w1, b1, w2, b2, w3, b3))

    # Auto tiling: grid=(1,) on single-TC v5e/v6e; splits across TCs on v7x for large B.
    out = jax.block_until_ready(actor_deterministic_forward(x, params))
    ref = reference_forward(x, w1, b1, w2, b2, w3, b3)
    assert out.shape == (batch, num_action), out.shape
    assert jnp.allclose(out, ref, atol=1e-3, rtol=1e-3), "mismatch vs reference (auto tiling)"

    # Multi-step path: exercises batch padding + the "parallel" multi-TC sharding path.
    x2 = jax.random.normal(jax.random.PRNGKey(1), (40, num_state), jnp.float32)
    out2 = jax.block_until_ready(actor_deterministic_forward(x2, params, grid_steps=2))
    ref2 = reference_forward(x2, w1, b1, w2, b2, w3, b3)
    assert out2.shape == (40, num_action), out2.shape
    assert jnp.allclose(out2, ref2, atol=1e-3, rtol=1e-3), "mismatch vs reference (2-step grid)"

    print("KERNEL_OK")
</pallas_src>

<mosaic_0001>
module attributes {stable_mosaic.version = 11 : i64} {
  func.func @actor_kernel(%arg0: i32, %arg1: memref<256x16xbf16, #tpu.memory_space<vmem>>, %arg2: memref<16x128xbf16, #tpu.memory_space<vmem>>, %arg3: memref<1x128xf32, #tpu.memory_space<vmem>>, %arg4: memref<128x128xbf16, #tpu.memory_space<vmem>>, %arg5: memref<1x128xf32, #tpu.memory_space<vmem>>, %arg6: memref<128x8xbf16, #tpu.memory_space<vmem>>, %arg7: memref<1x8xf32, #tpu.memory_space<vmem>>, %arg8: memref<256x8xf32, #tpu.memory_space<vmem>>) attributes {dimension_semantics = [#tpu.dimension_semantics<parallel>], iteration_bounds = array<i64: 1>, scalar_prefetch = 0 : i64, scratch_operands = 0 : i64, tpu.core_type = #tpu.core_type<tc>, window_params = [{transform_indices = @transform_0, window_bounds = array<i64: 256, 16>}, {pipeline_mode = #tpu.pipeline_mode<synchronous>, transform_indices = @transform_1, window_bounds = array<i64: 16, 128>}, {pipeline_mode = #tpu.pipeline_mode<synchronous>, transform_indices = @transform_2, window_bounds = array<i64: 1, 128>}, {pipeline_mode = #tpu.pipeline_mode<synchronous>, transform_indices = @transform_3, window_bounds = array<i64: 128, 128>}, {pipeline_mode = #tpu.pipeline_mode<synchronous>, transform_indices = @transform_4, window_bounds = array<i64: 1, 128>}, {pipeline_mode = #tpu.pipeline_mode<synchronous>, transform_indices = @transform_5, window_bounds = array<i64: 128, 8>}, {pipeline_mode = #tpu.pipeline_mode<synchronous>, transform_indices = @transform_6, window_bounds = array<i64: 1, 8>}, {transform_indices = @transform_7, window_bounds = array<i64: 256, 8>}]} {
    %c0 = arith.constant 0 : index
    %c0_0 = arith.constant 0 : index
    %0 = vector.load %arg1[%c0, %c0_0] : memref<256x16xbf16, #tpu.memory_space<vmem>>, vector<256x16xbf16>
    %c0_1 = arith.constant 0 : index
    %c0_2 = arith.constant 0 : index
    %1 = vector.load %arg2[%c0_1, %c0_2] : memref<16x128xbf16, #tpu.memory_space<vmem>>, vector<16x128xbf16>
    %cst = arith.constant dense<0.000000e+00> : vector<256x128xf32>
    %2 = tpu.matmul %0, %1, %cst {dimension_numbers = #tpu.dot_dimension_numbers<[1], [0], [0], [1], [0, 0, 1, 1], [], []>} : vector<256x16xbf16>, vector<16x128xbf16>, vector<256x128xf32> -> vector<256x128xf32>
    %c0_3 = arith.constant 0 : index
    %c0_4 = arith.constant 0 : index
    %3 = vector.load %arg3[%c0_3, %c0_4] : memref<1x128xf32, #tpu.memory_space<vmem>>, vector<1x128xf32>
    %4 = vector.broadcast %3 : vector<1x128xf32> to vector<256x128xf32>
    %5 = arith.addf %2, %4 : vector<256x128xf32>
    %cst_5 = arith.constant 0.000000e+00 : f32
    %6 = vector.broadcast %cst_5 : f32 to vector<256x128xf32>
    %7 = arith.maximumf %5, %6 : vector<256x128xf32>
    %8 = arith.truncf %7 : vector<256x128xf32> to vector<256x128xbf16>
    %c0_6 = arith.constant 0 : index
    %c0_7 = arith.constant 0 : index
    %9 = vector.load %arg4[%c0_6, %c0_7] : memref<128x128xbf16, #tpu.memory_space<vmem>>, vector<128x128xbf16>
    %cst_8 = arith.constant dense<0.000000e+00> : vector<256x128xf32>
    %10 = tpu.matmul %8, %9, %cst_8 {dimension_numbers = #tpu.dot_dimension_numbers<[1], [0], [0], [1], [0, 0, 1, 1], [], []>} : vector<256x128xbf16>, vector<128x128xbf16>, vector<256x128xf32> -> vector<256x128xf32>
    %c0_9 = arith.constant 0 : index
    %c0_10 = arith.constant 0 : index
    %11 = vector.load %arg5[%c0_9, %c0_10] : memref<1x128xf32, #tpu.memory_space<vmem>>, vector<1x128xf32>
    %12 = vector.broadcast %11 : vector<1x128xf32> to vector<256x128xf32>
    %13 = arith.addf %10, %12 : vector<256x128xf32>
    %cst_11 = arith.constant 0.000000e+00 : f32
    %14 = vector.broadcast %cst_11 : f32 to vector<256x128xf32>
    %15 = arith.maximumf %13, %14 : vector<256x128xf32>
    %16 = arith.truncf %15 : vector<256x128xf32> to vector<256x128xbf16>
    %c0_12 = arith.constant 0 : index
    %c0_13 = arith.constant 0 : index
    %17 = vector.load %arg6[%c0_12, %c0_13] : memref<128x8xbf16, #tpu.memory_space<vmem>>, vector<128x8xbf16>
    %cst_14 = arith.constant dense<0.000000e+00> : vector<256x8xf32>
    %18 = tpu.matmul %16, %17, %cst_14 {dimension_numbers = #tpu.dot_dimension_numbers<[1], [0], [0], [1], [0, 0, 1, 1], [], []>} : vector<256x128xbf16>, vector<128x8xbf16>, vector<256x8xf32> -> vector<256x8xf32>
    %c0_15 = arith.constant 0 : index
    %c0_16 = arith.constant 0 : index
    %19 = vector.load %arg7[%c0_15, %c0_16] : memref<1x8xf32, #tpu.memory_space<vmem>>, vector<1x8xf32>
    %20 = vector.broadcast %19 : vector<1x8xf32> to vector<256x8xf32>
    %21 = arith.addf %18, %20 : vector<256x8xf32>
    %22 = math.tanh %21 : vector<256x8xf32>
    %c0_17 = arith.constant 0 : index
    %c0_18 = arith.constant 0 : index
    %23 = vector.load %arg8[%c0_17, %c0_18] : memref<256x8xf32, #tpu.memory_space<vmem>>, vector<256x8xf32>
    tpu.vector_store %arg8[%c0_17, %c0_18], %22 {strides = array<i32>} : memref<256x8xf32, #tpu.memory_space<vmem>>, vector<256x8xf32>,
    return
  }
  func.func @transform_0(%arg0: i32) -> (i32, i32) {
    %c0_i32 = arith.constant 0 : i32
    %c0_i32_0 = arith.constant 0 : i32
    return %arg0, %c0_i32 : i32, i32
  }
  func.func @transform_1(%arg0: i32) -> (i32, i32) {
    %c0_i32 = arith.constant 0 : i32
    %c0_i32_0 = arith.constant 0 : i32
    %c0_i32_1 = arith.constant 0 : i32
    return %c0_i32, %c0_i32_0 : i32, i32
  }
  func.func @transform_2(%arg0: i32) -> (i32, i32) {
    %c0_i32 = arith.constant 0 : i32
    %c0_i32_0 = arith.constant 0 : i32
    %c0_i32_1 = arith.constant 0 : i32
    return %c0_i32, %c0_i32_0 : i32, i32
  }
  func.func @transform_3(%arg0: i32) -> (i32, i32) {
    %c0_i32 = arith.constant 0 : i32
    %c0_i32_0 = arith.constant 0 : i32
    %c0_i32_1 = arith.constant 0 : i32
    return %c0_i32, %c0_i32_0 : i32, i32
  }
  func.func @transform_4(%arg0: i32) -> (i32, i32) {
    %c0_i32 = arith.constant 0 : i32
    %c0_i32_0 = arith.constant 0 : i32
    %c0_i32_1 = arith.constant 0 : i32
    return %c0_i32, %c0_i32_0 : i32, i32
  }
  func.func @transform_5(%arg0: i32) -> (i32, i32) {
    %c0_i32 = arith.constant 0 : i32
    %c0_i32_0 = arith.constant 0 : i32
    %c0_i32_1 = arith.constant 0 : i32
    return %c0_i32, %c0_i32_0 : i32, i32
  }
  func.func @transform_6(%arg0: i32) -> (i32, i32) {
    %c0_i32 = arith.constant 0 : i32
    %c0_i32_0 = arith.constant 0 : i32
    %c0_i32_1 = arith.constant 0 : i32
    return %c0_i32, %c0_i32_0 : i32, i32
  }
  func.func @transform_7(%arg0: i32) -> (i32, i32) {
    %c0_i32 = arith.constant 0 : i32
    %c0_i32_0 = arith.constant 0 : i32
    return %arg0, %c0_i32 : i32, i32
  }
}

</mosaic_0001>

<bundles_post_ra>
// kernel: _actor_forward_impl.1
= control target key start
LH: loop header
LB: loop body
LE: loop exit
PB: predicated region body
PF: predicated region fallthrough
CT: control target
= control target key end

     0   :  { %vm154_vm0 = vcmask 130048   ;;  %vm956_vm1 = vcmask 64512   ;;  %s1739_s1 = inlined_call_operand.vmem [shape: bf16[16,128], index: 1, kind: input, shape index: {}]   ;;  %s1740_s0 = inlined_call_operand.vmem [shape: bf16[256,16], index: 0, kind: input, shape index: {}]   ;;  %s1741_s3 = inlined_call_operand.vmem [shape: bf16[128,128], index: 3, kind: input, shape index: {}]   ;;  %s1742_s5 = inlined_call_operand.vmem [shape: bf16[128,8], index: 5, kind: input, shape index: {}]   ;;  %s1743_s2 = inlined_call_operand.vmem [shape: f32[1,128], index: 2, kind: input, shape index: {}]   ;;  %s1744_s4 = inlined_call_operand.vmem [shape: f32[1,128], index: 4, kind: input, shape index: {}]   ;;  %s1745_s6 = inlined_call_operand.vmem [shape: f32[1,8], index: 6, kind: input, shape index: {}]   ;;  %s1746_s7 = inlined_call_operand.vmem [shape: f32[256,8], index: 7, kind: output, shape index: {}]  }
   0x1   :  { %v1242_v0 = vld [vmem:[%s1739_s1] sm:$0xff]   ;;  %v1244_v2 = vld [vmem:[%s1740_s0 + $0x8] sm:$0xff]   ;;  %v1245_v3 = vld [vmem:[%s1740_s0 + $0x10] sm:$0xff]  }
   0x2   :  { %v1243_v1 = vld [vmem:[%s1740_s0] sm:$0xff]   ;;  %1110 = vmatprep.subr.bf16.mxu0 %v1242_v0  ;;  %1240 = vmatprep.subr.bf16.mxu1 %v1242_v0  ;;  %v1246_v4 = vld [vmem:[%s1740_s0 + $0x18] sm:$0xff]   ;;  %v1252_v7 = vld [vmem:[%s1740_s0 + $0x48] sm:$0xff]  }
   0x3   :  { %1111 = vmatpush3.bf16.msra.mxu0 %v1242_v0  ;;  %1112 = vmatprep.mubr.msk.bf16.mxu0 %vm154_vm0, %v1243_v1  ;;  %v1247_v5 = vld [vmem:[%s1740_s0 + $0x20] sm:$0xff]   ;;  %v1253_v8 = vld [vmem:[%s1740_s0 + $0x50] sm:$0xff]   ;;  %v1254_v9 = vld [vmem:[%s1740_s0 + $0x58] sm:$0xff]  }
   0x4   :  { %1241 = vmatpush3.bf16.msra.mxu1 %v1242_v0  ;;  %v1251_v6 = vld [vmem:[%s1740_s0 + $0x40] sm:$0xff]   ;;  %v1248_v10 = vld [vmem:[%s1740_s0 + $0x28] sm:$0xff]   ;;  %v1249_v14 = vld [vmem:[%s1740_s0 + $0x30] sm:$0xff]  }
   0x5   :  { %1128 = vmatprep.mubr.msk.bf16.mxu1 %vm154_vm0, %v1251_v6  ;;  %v1255_v11 = vld [vmem:[%s1740_s0 + $0x60] sm:$0xff]   ;;  %v1260_v13 = vld [vmem:[%s1741_s3 + $0x8] sm:$0xff]   ;;  %v1261_v15 = vld [vmem:[%s1741_s3 + $0x10] sm:$0xff]  }
   0x6   :  { %1113 = vmatmul.mubr.msk.bf16.vlgmr.msra.gmra.mrb[0].mxu0 %vm154_vm0, %v1244_v2  ;;  %v1259_v12 = vld [vmem:[%s1741_s3] sm:$0xff]   ;;  %v1256_v16 = vld [vmem:[%s1740_s0 + $0x68] sm:$0xff]   ;;  %v1257_v17 = vld [vmem:[%s1740_s0 + $0x70] sm:$0xff]  }
   0x7   :  { %1116 = vmatprep.mubr.msk.bf16.mxu0 %vm154_vm0, %v1245_v3  ;;  %1129 = vmatmul.mubr.msk.bf16.vlgmr.msra.gmra.mrb[0].mxu1 %vm154_vm0, %v1252_v7  ;;  %v1250_v18 = vld [vmem:[%s1740_s0 + $0x38] sm:$0xff]   ;;  %v1263_v20 = vld [vmem:[%s1741_s3 + $0x20] sm:$0xff]   ;;  %v1264_v22 = vld [vmem:[%s1741_s3 + $0x28] sm:$0xff]  }
   0x8   :  { %1132 = vmatprep.mubr.msk.bf16.mxu1 %vm154_vm0, %v1253_v8  ;;  %1144 = vmatprep.subr.bf16.mxu1 %v1259_v12  ;;  %v1262_v19 = vld [vmem:[%s1741_s3 + $0x18] sm:$0xff]   ;;  %v1265_v23 = vld [vmem:[%s1741_s3 + $0x30] sm:$0xff]   ;;  %v1267_v25 = vld [vmem:[%s1742_s5] sm:$0xff]  }
   0x9   :  { %1145 = vmatpush3.bf16.msra.mxu1 %v1259_v12  ;;  %v1258_v21 = vld [vmem:[%s1740_s0 + $0x78] sm:$0xff]   ;;  %v1268_v26 = vld [vmem:[%s1742_s5 + $0x8] sm:$0xff]   ;;  %1192 = vmatprep.subr.bf16.mxu0 %v1267_v25  ;;  %v1269_v27 = vld [vmem:[%s1742_s5 + $0x10] sm:$0xff]  }
   0xa   :  { %1146 = vmatprep.subr.bf16.mxu1 %v1260_v13  ;;  %v1266_v24 = vld [vmem:[%s1741_s3 + $0x38] sm:$0xff]   ;;  %1193 = vmatpush3.bf16.msra.mxu0 %v1267_v25  ;;  %v1271_v29 = vld [vmem:[%s1742_s5 + $0x20] sm:$0xff]   ;;  %v1272_v30 = vld [vmem:[%s1742_s5 + $0x28] sm:$0xff]  }
   0xb   :  { %1194 = vmatprep.subr.bf16.mxu0 %v1268_v26  ;;  %v1270_v28 = vld [vmem:[%s1742_s5 + $0x18] sm:$0xff]   ;;  %v1491_v31 = vld [vmem:[%s1743_s2] ss:$0 sm:$0xff] }
   0xd   :  { %1147 = vmatpush3.bf16.msra.mxu1 %v1260_v13 }
   0xe   :  { %1117 = vmatmul.mubr.msk.bf16.gmra.mrb[4].mxu0 %vm154_vm0, %v1246_v4  ;;  %1148 = vmatprep.subr.bf16.mxu1 %v1261_v15 }
   0xf   :  { %1120 = vmatprep.mubr.msk.bf16.mxu0 %vm154_vm0, %v1247_v5  ;;  %1133 = vmatmul.mubr.msk.bf16.gmra.mrb[4].mxu1 %vm154_vm0, %v1254_v9 }
  0x10   :  { %1136 = vmatprep.mubr.msk.bf16.mxu1 %vm154_vm0, %v1255_v11  ;;  %1195 = vmatpush3.bf16.msra.mxu0 %v1268_v26 }
  0x11   :  { %1149 = vmatpush3.bf16.msra.mxu1 %v1261_v15  ;;  %1196 = vmatprep.subr.bf16.mxu0 %v1269_v27 }
  0x12   :  { %1150 = vmatprep.subr.bf16.mxu1 %v1262_v19 }
  0x14   :  { %1197 = vmatpush3.bf16.msra.mxu0 %v1269_v27 }
  0x15   :  { %1151 = vmatpush3.bf16.msra.mxu1 %v1262_v19  ;;  %1198 = vmatprep.subr.bf16.mxu0 %v1270_v28 }
  0x16   :  { %1121 = vmatmul.mubr.msk.bf16.gmra.mrb[8].mxu0 %vm154_vm0, %v1248_v10  ;;  %1152 = vmatprep.subr.bf16.mxu1 %v1263_v20 }
  0x17   :  { %1124 = vmatprep.mubr.msk.bf16.mxu0 %vm154_vm0, %v1249_v14  ;;  %1137 = vmatmul.mubr.msk.bf16.gmra.mrb[8].mxu1 %vm154_vm0, %v1256_v16 }
  0x18   :  { %1140 = vmatprep.mubr.msk.bf16.mxu1 %vm154_vm0, %v1257_v17  ;;  %1199 = vmatpush3.bf16.msra.mxu0 %v1270_v28 }
  0x19   :  { %1153 = vmatpush3.bf16.msra.mxu1 %v1263_v20  ;;  %1200 = vmatprep.subr.bf16.mxu0 %v1271_v29 }
  0x1a   :  { %1154 = vmatprep.subr.bf16.mxu1 %v1264_v22 }
  0x1c   :  { %1201 = vmatpush3.bf16.msra.mxu0 %v1271_v29 }
  0x1d   :  { %1155 = vmatpush3.bf16.msra.mxu1 %v1264_v22  ;;  %1202 = vmatprep.subr.bf16.mxu0 %v1272_v30 }
  0x1e   :  { %1125 = vmatmul.mubr.msk.bf16.gmra.mrb[12].mxu0 %vm154_vm0, %v1250_v18  ;;  %1156 = vmatprep.subr.bf16.mxu1 %v1265_v23 }
  0x1f   :  { %1141 = vmatmul.mubr.msk.bf16.gmra.mrb[12].mxu1 %vm154_vm0, %v1258_v21 }
  0x20   :  { %1203 = vmatpush3.bf16.msra.mxu0 %v1272_v30 }
  0x21   :  { %1157 = vmatpush3.bf16.msra.mxu1 %v1265_v23 }
  0x22   :  { %1158 = vmatprep.subr.bf16.mxu1 %v1266_v24 }
  0x25   :  { %1159 = vmatpush3.bf16.msra.mxu1 %v1266_v24 }
  0xd9   :  { %v1114_v32 = vpop.f32.mrb[0].mxu0 }
  0xda   :  { %v246_v33 = vadd.f32 %v1114_v32, %v1491_v31  ;;  %v237_v34 = vpop.f32.mrb[1].mxu0  ;;  %v1130_v44 = vpop.f32.mrb[0].mxu1 }
  0xdb   :  { %v238_v35 = vadd.f32 %v1491_v31, %v237_v34  ;;  %v1115_v36 = vpop.f32.mrb[2].mxu0  ;;  %v310_v46 = vadd.f32 %v1130_v44, %v1491_v31  ;;  %v301_v47 = vpop.f32.mrb[1].mxu1 }
  0xdc   :  { %v249_v37 = vadd.f32 %v1115_v36, %v1491_v31  ;;  %v240_v38 = vpop.f32.mrb[3].mxu0  ;;  %v366_v40 = vmax.f32 %v246_v33, 0.0  ;;  %v302_v50 = vadd.f32 %v1491_v31, %v301_v47  ;;  %v1131_v51 = vpop.f32.mrb[2].mxu1 }
  0xdd   :  { %v241_v39 = vadd.f32 %v1491_v31, %v240_v38  ;;  %v364_v42 = vmax.f32 %v238_v35, 0.0  ;;  %v382_v54 = vmax.f32 %v310_v46, 0.0  ;;  %v313_v55 = vadd.f32 %v1131_v51, %v1491_v31  ;;  %v304_v56 = vpop.f32.mrb[3].mxu1 }
  0xde   :  { %v367_v41 = vmax.f32 %v249_v37, 0.0  ;;  %v380_v59 = vmax.f32 %v302_v50, 0.0  ;;  %v305_v60 = vadd.f32 %v1491_v31, %v304_v56 }
  0xdf   :  { %v365_v43 = vmax.f32 %v241_v39, 0.0  ;;  %v383_v63 = vmax.f32 %v313_v55, 0.0 }
  0xe0   :  { %v397_v45 = vpack.c.bf16 %v367_v41, %v366_v40  ;;  %v381_v1 = vmax.f32 %v305_v60, 0.0 }
  0xe1   :  { %v396_v48 = vpack.c.bf16 %v365_v43, %v364_v42  ;;  %v1118_v49 = vpop.f32.mrb[4].mxu0  ;;  %v1505_v4 = vpack.c.bf16 %v383_v63, %v382_v54 }
  0xe2   :  { %v262_v52 = vadd.f32 %v1118_v49, %v1491_v31  ;;  %v253_v53 = vpop.f32.mrb[5].mxu0  ;;  %v1507_v7 = vpack.c.bf16 %v381_v1, %v380_v59  ;;  %v1134_v8 = vpop.f32.mrb[4].mxu1 }
  0xe3   :  { %v254_v57 = vadd.f32 %v1491_v31, %v253_v53  ;;  %v1119_v58 = vpop.f32.mrb[6].mxu0  ;;  %1160 = vmatprep.mubr.bf16.mxu1 %v396_v48  ;;  %v326_v10 = vadd.f32 %v1134_v8, %v1491_v31  ;;  %v317_v11 = vpop.f32.mrb[5].mxu1 }
  0xe4   :  { %v265_v61 = vadd.f32 %v1119_v58, %v1491_v31  ;;  %v256_v62 = vpop.f32.mrb[7].mxu0  ;;  %1161 = vmatmul.mubr.bf16.vlgmr.msra.gmra.mrb[16].mxu1 %v397_v45  ;;  %v370_v2 = vmax.f32 %v262_v52, 0.0  ;;  %v318_v14 = vadd.f32 %v1491_v31, %v317_v11  ;;  %v1135_v15 = vpop.f32.mrb[6].mxu1 }
  0xe5   :  { %v257_v0 = vadd.f32 %v1491_v31, %v256_v62  ;;  %v368_v5 = vmax.f32 %v254_v57, 0.0  ;;  %v386_v18 = vmax.f32 %v326_v10, 0.0  ;;  %v329_v19 = vadd.f32 %v1135_v15, %v1491_v31  ;;  %v320_v20 = vpop.f32.mrb[7].mxu1 }
  0xe6   :  { %v371_v3 = vmax.f32 %v265_v61, 0.0  ;;  %v384_v23 = vmax.f32 %v318_v14, 0.0  ;;  %v321_v24 = vadd.f32 %v1491_v31, %v320_v20 }
  0xe7   :  { %v369_v6 = vmax.f32 %v257_v0, 0.0  ;;  %v387_v27 = vmax.f32 %v329_v19, 0.0  ;;  %v1273_v19 = vld [vmem:[%s1742_s5 + $0x30] sm:$0xff]  }
  0xe8   :  { %v399_v9 = vpack.c.bf16 %v371_v3, %v370_v2  ;;  %v385_v29 = vmax.f32 %v321_v24, 0.0  ;;  %1204 = vmatprep.subr.bf16.mxu0 %v1273_v19 }
  0xe9   :  { %v398_v12 = vpack.c.bf16 %v369_v6, %v368_v5  ;;  %v1122_v13 = vpop.f32.mrb[8].mxu0  ;;  %v407_v33 = vpack.c.bf16 %v387_v27, %v386_v18  ;;  %1205 = vmatpush3.bf16.msra.mxu0 %v1273_v19 }
  0xea   :  { %v278_v16 = vadd.f32 %v1122_v13, %v1491_v31  ;;  %v269_v17 = vpop.f32.mrb[9].mxu0  ;;  %v406_v36 = vpack.c.bf16 %v385_v29, %v384_v23  ;;  %v1138_v37 = vpop.f32.mrb[8].mxu1 }
  0xeb   :  { %v270_v21 = vadd.f32 %v1491_v31, %v269_v17  ;;  %v1123_v22 = vpop.f32.mrb[10].mxu0  ;;  %1164 = vmatprep.mubr.bf16.mxu1 %v398_v12  ;;  %v342_v39 = vadd.f32 %v1138_v37, %v1491_v31  ;;  %v333_v40 = vpop.f32.mrb[9].mxu1 }
  0xec   :  { %v281_v25 = vadd.f32 %v1123_v22, %v1491_v31  ;;  %v272_v26 = vpop.f32.mrb[11].mxu0  ;;  %1165 = vmatmul.mubr.bf16.gmra.mrb[20].mxu1 %v399_v9  ;;  %v374_v30 = vmax.f32 %v278_v16, 0.0  ;;  %v334_v43 = vadd.f32 %v1491_v31, %v333_v40  ;;  %v1139_v44 = vpop.f32.mrb[10].mxu1 }
  0xed   :  { %v273_v28 = vadd.f32 %v1491_v31, %v272_v26  ;;  %v372_v34 = vmax.f32 %v270_v21, 0.0  ;;  %v390_v47 = vmax.f32 %v342_v39, 0.0  ;;  %v345_v48 = vadd.f32 %v1139_v44, %v1491_v31  ;;  %v336_v49 = vpop.f32.mrb[11].mxu1 }
  0xee   :  { %v375_v32 = vmax.f32 %v281_v25, 0.0  ;;  %v388_v52 = vmax.f32 %v334_v43, 0.0  ;;  %v337_v53 = vadd.f32 %v1491_v31, %v336_v49 }
  0xef   :  { %v373_v35 = vmax.f32 %v273_v28, 0.0  ;;  %v391_v56 = vmax.f32 %v345_v48, 0.0 }
  0xf0   :  { %v401_v38 = vpack.c.bf16 %v375_v32, %v374_v30  ;;  %v389_v58 = vmax.f32 %v337_v53, 0.0 }
  0xf1   :  { %v400_v41 = vpack.c.bf16 %v373_v35, %v372_v34  ;;  %v1126_v42 = vpop.f32.mrb[12].mxu0  ;;  %v409_v61 = vpack.c.bf16 %v391_v56, %v390_v47 }
  0xf2   :  { %v294_v45 = vadd.f32 %v1126_v42, %v1491_v31  ;;  %v285_v46 = vpop.f32.mrb[13].mxu0  ;;  %v408_v0 = vpack.c.bf16 %v389_v58, %v388_v52  ;;  %v1142_v1 = vpop.f32.mrb[12].mxu1 }
  0xf3   :  { %v286_v50 = vadd.f32 %v1491_v31, %v285_v46  ;;  %v1127_v51 = vpop.f32.mrb[14].mxu0  ;;  %1168 = vmatprep.mubr.bf16.mxu1 %v400_v41  ;;  %v358_v3 = vadd.f32 %v1142_v1, %v1491_v31  ;;  %v349_v5 = vpop.f32.mrb[13].mxu1 }
  0xf4   :  { %v297_v54 = vadd.f32 %v1127_v51, %v1491_v31  ;;  %v288_v55 = vpop.f32.mrb[15].mxu0  ;;  %1169 = vmatmul.mubr.bf16.gmra.mrb[24].mxu1 %v401_v38  ;;  %v378_v59 = vmax.f32 %v294_v45, 0.0  ;;  %v350_v8 = vadd.f32 %v1491_v31, %v349_v5  ;;  %v1143_v9 = vpop.f32.mrb[14].mxu1 }
  0xf5   :  { %v289_v57 = vadd.f32 %v1491_v31, %v288_v55  ;;  %v376_v62 = vmax.f32 %v286_v50, 0.0  ;;  %v394_v10 = vmax.f32 %v358_v3, 0.0  ;;  %v361_v11 = vadd.f32 %v1143_v9, %v1491_v31  ;;  %v352_v12 = vpop.f32.mrb[15].mxu1 }
  0xf6   :  { %v379_v60 = vmax.f32 %v297_v54, 0.0  ;;  %v392_v13 = vmax.f32 %v350_v8, 0.0  ;;  %v353_v14 = vadd.f32 %v1491_v31, %v352_v12  ;;  %v1274_v31 = vld [vmem:[%s1742_s5 + $0x38] sm:$0xff]  }
  0xf7   :  { %v377_v63 = vmax.f32 %v289_v57, 0.0  ;;  %v395_v15 = vmax.f32 %v361_v11, 0.0  ;;  %1206 = vmatprep.subr.bf16.mxu0 %v1274_v31 }
  0xf8   :  { %v403_v2 = vpack.c.bf16 %v379_v60, %v378_v59  ;;  %v393_v16 = vmax.f32 %v353_v14, 0.0  ;;  %1207 = vmatpush3.bf16.msra.mxu0 %v1274_v31 }
  0xf9   :  { %v402_v6 = vpack.c.bf16 %v377_v63, %v376_v62  ;;  %v411_v17 = vpack.c.bf16 %v395_v15, %v394_v10 }
  0xfa   :  { %v410_v18 = vpack.c.bf16 %v393_v16, %v392_v13 }
  0xfb   :  { %1172 = vmatprep.mubr.bf16.mxu1 %v402_v6 }
  0xfc   :  { %1173 = vmatmul.mubr.bf16.gmra.mrb[28].mxu1 %v403_v2 }
  0xfd   :  { %1176 = vmatprep.mubr.bf16.mxu1 %v1507_v7 }
 0x104   :  { %1177 = vmatmul.mubr.bf16.gmra.mrb[32].mxu1 %v1505_v4  ;;  %v1540_v4 = vld [vmem:[%s1744_s4] ss:$0 sm:$0xff] }
 0x105   :  { %1180 = vmatprep.mubr.bf16.mxu1 %v406_v36 }
 0x10c   :  { %1181 = vmatmul.mubr.bf16.gmra.mrb[36].mxu1 %v407_v33 }
 0x10d   :  { %1184 = vmatprep.mubr.bf16.mxu1 %v408_v0 }
 0x114   :  { %1185 = vmatmul.mubr.bf16.gmra.mrb[40].mxu1 %v409_v61 }
 0x115   :  { %1188 = vmatprep.mubr.bf16.mxu1 %v410_v18 }
 0x11c   :  { %1189 = vmatmul.mubr.bf16.gmra.mrb[44].mxu1 %v411_v17 }
 0x1b7   :  { %v1162_v7 = vpop.f32.mrb[16].mxu1 }
 0x1b8   :  { %v526_v20 = vadd.f32 %v1162_v7, %v1540_v4  ;;  %v517_v21 = vpop.f32.mrb[17].mxu1 }
 0x1b9   :  { %v518_v22 = vadd.f32 %v1540_v4, %v517_v21  ;;  %v1163_v23 = vpop.f32.mrb[18].mxu1 }
 0x1ba   :  { %v529_v24 = vadd.f32 %v1163_v23, %v1540_v4  ;;  %v520_v25 = vpop.f32.mrb[19].mxu1  ;;  %v646_v27 = vmax.f32 %v526_v20, 0.0 }
 0x1bb   :  { %v521_v26 = vadd.f32 %v1540_v4, %v520_v25  ;;  %v644_v29 = vmax.f32 %v518_v22, 0.0 }
 0x1bc   :  { %v647_v28 = vmax.f32 %v529_v24, 0.0 }
 0x1bd   :  { %v645_v30 = vmax.f32 %v521_v26, 0.0 }
 0x1be   :  { %v677_v32 = vpack.c.bf16 %v647_v28, %v646_v27 }
 0x1bf   :  { %v676_v33 = vpack.c.bf16 %v645_v30, %v644_v29  ;;  %v1166_v34 = vpop.f32.mrb[20].mxu1 }
 0x1c0   :  { %v542_v35 = vadd.f32 %v1166_v34, %v1540_v4  ;;  %v533_v36 = vpop.f32.mrb[21].mxu1 }
 0x1c1   :  { %v534_v37 = vadd.f32 %v1540_v4, %v533_v36  ;;  %v1167_v38 = vpop.f32.mrb[22].mxu1  ;;  %1208 = vmatprep.mubr.bf16.mxu0 %v676_v33 }
 0x1c2   :  { %v545_v39 = vadd.f32 %v1167_v38, %v1540_v4  ;;  %v536_v40 = vpop.f32.mrb[23].mxu1  ;;  %1209 = vmatmul.mubr.bf16.vlgmr.msra.gmra.mrb[16].mxu0 %v677_v32  ;;  %v650_v42 = vmax.f32 %v542_v35, 0.0 }
 0x1c3   :  { %v537_v41 = vadd.f32 %v1540_v4, %v536_v40  ;;  %v648_v44 = vmax.f32 %v534_v37, 0.0 }
 0x1c4   :  { %v651_v43 = vmax.f32 %v545_v39, 0.0 }
 0x1c5   :  { %v649_v45 = vmax.f32 %v537_v41, 0.0 }
 0x1c6   :  { %v679_v46 = vpack.c.bf16 %v651_v43, %v650_v42 }
 0x1c7   :  { %v678_v47 = vpack.c.bf16 %v649_v45, %v648_v44  ;;  %v1170_v48 = vpop.f32.mrb[24].mxu1 }
 0x1c8   :  { %v558_v49 = vadd.f32 %v1170_v48, %v1540_v4  ;;  %v549_v50 = vpop.f32.mrb[25].mxu1 }
 0x1c9   :  { %v550_v51 = vadd.f32 %v1540_v4, %v549_v50  ;;  %v1171_v52 = vpop.f32.mrb[26].mxu1  ;;  %1212 = vmatprep.mubr.bf16.mxu0 %v678_v47 }
 0x1ca   :  { %v561_v53 = vadd.f32 %v1171_v52, %v1540_v4  ;;  %v552_v54 = vpop.f32.mrb[27].mxu1  ;;  %1213 = vmatmul.mubr.bf16.gmra.mrb[20].mxu0 %v679_v46  ;;  %v654_v56 = vmax.f32 %v558_v49, 0.0 }
 0x1cb   :  { %v553_v55 = vadd.f32 %v1540_v4, %v552_v54  ;;  %v652_v58 = vmax.f32 %v550_v51, 0.0 }
 0x1cc   :  { %v655_v57 = vmax.f32 %v561_v53, 0.0 }
 0x1cd   :  { %v653_v59 = vmax.f32 %v553_v55, 0.0 }
 0x1ce   :  { %v681_v60 = vpack.c.bf16 %v655_v57, %v654_v56 }
 0x1cf   :  { %v680_v61 = vpack.c.bf16 %v653_v59, %v652_v58  ;;  %v1174_v62 = vpop.f32.mrb[28].mxu1 }
 0x1d0   :  { %v574_v63 = vadd.f32 %v1174_v62, %v1540_v4  ;;  %v565_v0 = vpop.f32.mrb[29].mxu1 }
 0x1d1   :  { %v566_v1 = vadd.f32 %v1540_v4, %v565_v0  ;;  %v1175_v2 = vpop.f32.mrb[30].mxu1  ;;  %1216 = vmatprep.mubr.bf16.mxu0 %v680_v61 }
 0x1d2   :  { %v577_v3 = vadd.f32 %v1175_v2, %v1540_v4  ;;  %v568_v5 = vpop.f32.mrb[31].mxu1  ;;  %1217 = vmatmul.mubr.bf16.gmra.mrb[24].mxu0 %v681_v60  ;;  %v658_v8 = vmax.f32 %v574_v63, 0.0 }
 0x1d3   :  { %v569_v6 = vadd.f32 %v1540_v4, %v568_v5  ;;  %v656_v10 = vmax.f32 %v566_v1, 0.0 }
 0x1d4   :  { %v659_v9 = vmax.f32 %v577_v3, 0.0 }
 0x1d5   :  { %v657_v11 = vmax.f32 %v569_v6, 0.0  ;;  %v1577_v6 = vld [vmem:[%s1745_s6] ss:$0 sm:$0xff] }
 0x1d6   :  { %v683_v12 = vpack.c.bf16 %v659_v9, %v658_v8 }
 0x1d7   :  { %v682_v13 = vpack.c.bf16 %v657_v11, %v656_v10  ;;  %v1178_v14 = vpop.f32.mrb[32].mxu1 }
 0x1d8   :  { %v590_v15 = vadd.f32 %v1178_v14, %v1540_v4  ;;  %v581_v16 = vpop.f32.mrb[33].mxu1 }
 0x1d9   :  { %v582_v17 = vadd.f32 %v1540_v4, %v581_v16  ;;  %v1179_v18 = vpop.f32.mrb[34].mxu1  ;;  %1220 = vmatprep.mubr.bf16.mxu0 %v682_v13 }
 0x1da   :  { %v593_v19 = vadd.f32 %v1179_v18, %v1540_v4  ;;  %v584_v31 = vpop.f32.mrb[35].mxu1  ;;  %1221 = vmatmul.mubr.bf16.gmra.mrb[28].mxu0 %v683_v12  ;;  %v662_v20 = vmax.f32 %v590_v15, 0.0 }
 0x1db   :  { %v585_v7 = vadd.f32 %v1540_v4, %v584_v31  ;;  %v660_v22 = vmax.f32 %v582_v17, 0.0 }
 0x1dc   :  { %v663_v21 = vmax.f32 %v593_v19, 0.0 }
 0x1dd   :  { %v661_v23 = vmax.f32 %v585_v7, 0.0 }
 0x1de   :  { %v685_v24 = vpack.c.bf16 %v663_v21, %v662_v20 }
 0x1df   :  { %v684_v25 = vpack.c.bf16 %v661_v23, %v660_v22  ;;  %v1182_v26 = vpop.f32.mrb[36].mxu1 }
 0x1e0   :  { %v606_v27 = vadd.f32 %v1182_v26, %v1540_v4  ;;  %v597_v28 = vpop.f32.mrb[37].mxu1 }
 0x1e1   :  { %v598_v29 = vadd.f32 %v1540_v4, %v597_v28  ;;  %v1183_v30 = vpop.f32.mrb[38].mxu1  ;;  %1224 = vmatprep.mubr.bf16.mxu0 %v684_v25 }
 0x1e2   :  { %v609_v32 = vadd.f32 %v1183_v30, %v1540_v4  ;;  %v600_v33 = vpop.f32.mrb[39].mxu1  ;;  %1225 = vmatmul.mubr.bf16.gmra.mrb[32].mxu0 %v685_v24  ;;  %v666_v35 = vmax.f32 %v606_v27, 0.0 }
 0x1e3   :  { %v601_v34 = vadd.f32 %v1540_v4, %v600_v33  ;;  %v664_v37 = vmax.f32 %v598_v29, 0.0 }
 0x1e4   :  { %v667_v36 = vmax.f32 %v609_v32, 0.0 }
 0x1e5   :  { %v665_v38 = vmax.f32 %v601_v34, 0.0 }
 0x1e6   :  { %v687_v39 = vpack.c.bf16 %v667_v36, %v666_v35 }
 0x1e7   :  { %v686_v40 = vpack.c.bf16 %v665_v38, %v664_v37  ;;  %v1186_v41 = vpop.f32.mrb[40].mxu1 }
 0x1e8   :  { %v622_v42 = vadd.f32 %v1186_v41, %v1540_v4  ;;  %v613_v43 = vpop.f32.mrb[41].mxu1 }
 0x1e9   :  { %v614_v44 = vadd.f32 %v1540_v4, %v613_v43  ;;  %v1187_v45 = vpop.f32.mrb[42].mxu1  ;;  %1228 = vmatprep.mubr.bf16.mxu0 %v686_v40 }
 0x1ea   :  { %v625_v46 = vadd.f32 %v1187_v45, %v1540_v4  ;;  %v616_v47 = vpop.f32.mrb[43].mxu1  ;;  %1229 = vmatmul.mubr.bf16.gmra.mrb[36].mxu0 %v687_v39  ;;  %v670_v49 = vmax.f32 %v622_v42, 0.0 }
 0x1eb   :  { %v617_v48 = vadd.f32 %v1540_v4, %v616_v47  ;;  %v668_v51 = vmax.f32 %v614_v44, 0.0 }
 0x1ec   :  { %v671_v50 = vmax.f32 %v625_v46, 0.0 }
 0x1ed   :  { %v669_v52 = vmax.f32 %v617_v48, 0.0 }
 0x1ee   :  { %v689_v53 = vpack.c.bf16 %v671_v50, %v670_v49 }
 0x1ef   :  { %v688_v54 = vpack.c.bf16 %v669_v52, %v668_v51  ;;  %v1190_v55 = vpop.f32.mrb[44].mxu1 }
 0x1f0   :  { %v638_v56 = vadd.f32 %v1190_v55, %v1540_v4  ;;  %v629_v57 = vpop.f32.mrb[45].mxu1 }
 0x1f1   :  { %v630_v58 = vadd.f32 %v1540_v4, %v629_v57  ;;  %v1191_v59 = vpop.f32.mrb[46].mxu1  ;;  %1232 = vmatprep.mubr.bf16.mxu0 %v688_v54 }
 0x1f2   :  { %v641_v60 = vadd.f32 %v1191_v59, %v1540_v4  ;;  %v632_v61 = vpop.f32.mrb[47].mxu1  ;;  %1233 = vmatmul.mubr.bf16.gmra.mrb[40].mxu0 %v689_v53  ;;  %v674_v63 = vmax.f32 %v638_v56, 0.0 }
 0x1f3   :  { %v633_v62 = vadd.f32 %v1540_v4, %v632_v61  ;;  %v672_v1 = vmax.f32 %v630_v58, 0.0 }
 0x1f4   :  { %v675_v0 = vmax.f32 %v641_v60, 0.0 }
 0x1f5   :  { %v673_v2 = vmax.f32 %v633_v62, 0.0 }
 0x1f6   :  { %v691_v3 = vpack.c.bf16 %v675_v0, %v674_v63 }
 0x1f7   :  { %v690_v5 = vpack.c.bf16 %v673_v2, %v672_v1 }
 0x1f9   :  { %1236 = vmatprep.mubr.bf16.mxu0 %v690_v5 }
 0x1fa   :  { %1237 = vmatmul.mubr.bf16.gmra.mrb[44].mxu0 %v691_v3 }
 0x295   :  { %v1210_v8 = vpop.f32.mrb[16].mxu0 }
 0x296   :  { %v806_v9 = vadd.f32 %v1210_v8, %v1577_v6  ;;  %v797_v10 = vpop.f32.mrb[17].mxu0 }
 0x297   :  { %v798_v11 = vadd.f32 %v1577_v6, %v797_v10  ;;  %v1211_v4 = vpop.f32.mrb[18].mxu0 }
 0x298   :  { %1275 = vtanh.f32 %v806_v9  ;;  %v809_v12 = vadd.f32 %v1211_v4, %v1577_v6  ;;  %v800_v13 = vpop.f32.mrb[19].mxu0 }
 0x299   :  { %1277 = vtanh.f32 %v798_v11  ;;  %v801_v14 = vadd.f32 %v1577_v6, %v800_v13 }
 0x29a   :  { %1279 = vtanh.f32 %v809_v12 }
 0x29b   :  { %1281 = vtanh.f32 %v801_v14 }
 0x29d   :  { %v1214_v15 = vpop.f32.mrb[20].mxu0 }
 0x29e   :  { %v822_v16 = vadd.f32 %v1214_v15, %v1577_v6  ;;  %v813_v17 = vpop.f32.mrb[21].mxu0 }
 0x29f   :  { %v814_v18 = vadd.f32 %v1577_v6, %v813_v17  ;;  %v1215_v19 = vpop.f32.mrb[22].mxu0 }
 0x2a0   :  { %1283 = vtanh.f32 %v822_v16  ;;  %v825_v31 = vadd.f32 %v1215_v19, %v1577_v6  ;;  %v816_v7 = vpop.f32.mrb[23].mxu0 }
 0x2a1   :  { %1285 = vtanh.f32 %v814_v18  ;;  %v817_v20 = vadd.f32 %v1577_v6, %v816_v7 }
 0x2a2   :  { %v1276_v21 = vpop.eup %1275  ;;  %1287 = vtanh.f32 %v825_v31 }
 0x2a3   :  { %v1278_v22 = vpop.eup %1277  ;;  %959 = vst.msk [vmem:[%s1746_s7 + $0x10] sm:$0xff] %vm956_vm1, %v1276_v21  ;;  %1289 = vtanh.f32 %v817_v20 }
 0x2a4   :  { %v1280_v23 = vpop.eup %1279  ;;  %957 = vst.msk [vmem:[%s1746_s7] sm:$0xff] %vm956_vm1, %v1278_v22 }
 0x2a5   :  { %v1282_v24 = vpop.eup %1281  ;;  %960 = vst.msk [vmem:[%s1746_s7 + $0x18] sm:$0xff] %vm956_vm1, %v1280_v23  ;;  %v1218_v25 = vpop.f32.mrb[24].mxu0 }
 0x2a6   :  { %958 = vst.msk [vmem:[%s1746_s7 + $0x8] sm:$0xff] %vm956_vm1, %v1282_v24  ;;  %v838_v26 = vadd.f32 %v1218_v25, %v1577_v6  ;;  %v829_v27 = vpop.f32.mrb[25].mxu0 }
 0x2a7   :  { %v830_v28 = vadd.f32 %v1577_v6, %v829_v27  ;;  %v1219_v29 = vpop.f32.mrb[26].mxu0 }
 0x2a8   :  { %1291 = vtanh.f32 %v838_v26  ;;  %v841_v30 = vadd.f32 %v1219_v29, %v1577_v6  ;;  %v832_v32 = vpop.f32.mrb[27].mxu0 }
 0x2a9   :  { %1293 = vtanh.f32 %v830_v28  ;;  %v833_v33 = vadd.f32 %v1577_v6, %v832_v32 }
 0x2aa   :  { %v1284_v34 = vpop.eup %1283  ;;  %1295 = vtanh.f32 %v841_v30 }
 0x2ab   :  { %v1286_v35 = vpop.eup %1285  ;;  %963 = vst.msk [vmem:[%s1746_s7 + $0x30] sm:$0xff] %vm956_vm1, %v1284_v34  ;;  %1297 = vtanh.f32 %v833_v33 }
 0x2ac   :  { %v1288_v36 = vpop.eup %1287  ;;  %961 = vst.msk [vmem:[%s1746_s7 + $0x20] sm:$0xff] %vm956_vm1, %v1286_v35 }
 0x2ad   :  { %v1290_v37 = vpop.eup %1289  ;;  %964 = vst.msk [vmem:[%s1746_s7 + $0x38] sm:$0xff] %vm956_vm1, %v1288_v36  ;;  %v1222_v38 = vpop.f32.mrb[28].mxu0 }
 0x2ae   :  { %962 = vst.msk [vmem:[%s1746_s7 + $0x28] sm:$0xff] %vm956_vm1, %v1290_v37  ;;  %v854_v39 = vadd.f32 %v1222_v38, %v1577_v6  ;;  %v845_v40 = vpop.f32.mrb[29].mxu0 }
 0x2af   :  { %v846_v41 = vadd.f32 %v1577_v6, %v845_v40  ;;  %v1223_v42 = vpop.f32.mrb[30].mxu0 }
 0x2b0   :  { %1299 = vtanh.f32 %v854_v39  ;;  %v857_v43 = vadd.f32 %v1223_v42, %v1577_v6  ;;  %v848_v44 = vpop.f32.mrb[31].mxu0 }
 0x2b1   :  { %1301 = vtanh.f32 %v846_v41  ;;  %v849_v45 = vadd.f32 %v1577_v6, %v848_v44 }
 0x2b2   :  { %v1292_v46 = vpop.eup %1291  ;;  %1303 = vtanh.f32 %v857_v43 }
 0x2b3   :  { %v1294_v47 = vpop.eup %1293  ;;  %967 = vst.msk [vmem:[%s1746_s7 + $0x50] sm:$0xff] %vm956_vm1, %v1292_v46  ;;  %1305 = vtanh.f32 %v849_v45 }
 0x2b4   :  { %v1296_v48 = vpop.eup %1295  ;;  %965 = vst.msk [vmem:[%s1746_s7 + $0x40] sm:$0xff] %vm956_vm1, %v1294_v47 }
 0x2b5   :  { %v1298_v49 = vpop.eup %1297  ;;  %968 = vst.msk [vmem:[%s1746_s7 + $0x58] sm:$0xff] %vm956_vm1, %v1296_v48  ;;  %v1226_v50 = vpop.f32.mrb[32].mxu0 }
 0x2b6   :  { %966 = vst.msk [vmem:[%s1746_s7 + $0x48] sm:$0xff] %vm956_vm1, %v1298_v49  ;;  %v870_v51 = vadd.f32 %v1226_v50, %v1577_v6  ;;  %v861_v52 = vpop.f32.mrb[33].mxu0 }
 0x2b7   :  { %v862_v53 = vadd.f32 %v1577_v6, %v861_v52  ;;  %v1227_v54 = vpop.f32.mrb[34].mxu0 }
 0x2b8   :  { %1307 = vtanh.f32 %v870_v51  ;;  %v873_v55 = vadd.f32 %v1227_v54, %v1577_v6  ;;  %v864_v56 = vpop.f32.mrb[35].mxu0 }
 0x2b9   :  { %1309 = vtanh.f32 %v862_v53  ;;  %v865_v57 = vadd.f32 %v1577_v6, %v864_v56 }
 0x2ba   :  { %v1300_v58 = vpop.eup %1299  ;;  %1311 = vtanh.f32 %v873_v55 }
 0x2bb   :  { %v1302_v59 = vpop.eup %1301  ;;  %971 = vst.msk [vmem:[%s1746_s7 + $0x70] sm:$0xff] %vm956_vm1, %v1300_v58  ;;  %1313 = vtanh.f32 %v865_v57 }
 0x2bc   :  { %v1304_v60 = vpop.eup %1303  ;;  %969 = vst.msk [vmem:[%s1746_s7 + $0x60] sm:$0xff] %vm956_vm1, %v1302_v59 }
 0x2bd   :  { %v1306_v61 = vpop.eup %1305  ;;  %972 = vst.msk [vmem:[%s1746_s7 + $0x78] sm:$0xff] %vm956_vm1, %v1304_v60  ;;  %v1230_v62 = vpop.f32.mrb[36].mxu0 }
 0x2be   :  { %970 = vst.msk [vmem:[%s1746_s7 + $0x68] sm:$0xff] %vm956_vm1, %v1306_v61  ;;  %v886_v63 = vadd.f32 %v1230_v62, %v1577_v6  ;;  %v877_v0 = vpop.f32.mrb[37].mxu0 }
 0x2bf   :  { %v878_v1 = vadd.f32 %v1577_v6, %v877_v0  ;;  %v1231_v2 = vpop.f32.mrb[38].mxu0 }
 0x2c0   :  { %1315 = vtanh.f32 %v886_v63  ;;  %v889_v3 = vadd.f32 %v1231_v2, %v1577_v6  ;;  %v880_v5 = vpop.f32.mrb[39].mxu0 }
 0x2c1   :  { %1317 = vtanh.f32 %v878_v1  ;;  %v881_v8 = vadd.f32 %v1577_v6, %v880_v5 }
 0x2c2   :  { %v1308_v9 = vpop.eup %1307  ;;  %1319 = vtanh.f32 %v889_v3 }
 0x2c3   :  { %v1310_v10 = vpop.eup %1309  ;;  %975 = vst.msk [vmem:[%s1746_s7 + $0x90] sm:$0xff] %vm956_vm1, %v1308_v9  ;;  %1321 = vtanh.f32 %v881_v8 }
 0x2c4   :  { %v1312_v11 = vpop.eup %1311  ;;  %973 = vst.msk [vmem:[%s1746_s7 + $0x80] sm:$0xff] %vm956_vm1, %v1310_v10 }
 0x2c5   :  { %v1314_v4 = vpop.eup %1313  ;;  %976 = vst.msk [vmem:[%s1746_s7 + $0x98] sm:$0xff] %vm956_vm1, %v1312_v11  ;;  %v1234_v12 = vpop.f32.mrb[40].mxu0 }
 0x2c6   :  { %974 = vst.msk [vmem:[%s1746_s7 + $0x88] sm:$0xff] %vm956_vm1, %v1314_v4  ;;  %v902_v13 = vadd.f32 %v1234_v12, %v1577_v6  ;;  %v893_v14 = vpop.f32.mrb[41].mxu0 }
 0x2c7   :  { %v894_v15 = vadd.f32 %v1577_v6, %v893_v14  ;;  %v1235_v16 = vpop.f32.mrb[42].mxu0 }
 0x2c8   :  { %1323 = vtanh.f32 %v902_v13  ;;  %v905_v17 = vadd.f32 %v1235_v16, %v1577_v6  ;;  %v896_v18 = vpop.f32.mrb[43].mxu0 }
 0x2c9   :  { %1325 = vtanh.f32 %v894_v15  ;;  %v897_v19 = vadd.f32 %v1577_v6, %v896_v18 }
 0x2ca   :  { %v1316_v31 = vpop.eup %1315  ;;  %1327 = vtanh.f32 %v905_v17 }
 0x2cb   :  { %v1318_v7 = vpop.eup %1317  ;;  %979 = vst.msk [vmem:[%s1746_s7 + $0xb0] sm:$0xff] %vm956_vm1, %v1316_v31  ;;  %1329 = vtanh.f32 %v897_v19 }
 0x2cc   :  { %v1320_v20 = vpop.eup %1319  ;;  %977 = vst.msk [vmem:[%s1746_s7 + $0xa0] sm:$0xff] %vm956_vm1, %v1318_v7 }
 0x2cd   :  { %v1322_v21 = vpop.eup %1321  ;;  %980 = vst.msk [vmem:[%s1746_s7 + $0xb8] sm:$0xff] %vm956_vm1, %v1320_v20  ;;  %v1238_v22 = vpop.f32.mrb[44].mxu0 }
 0x2ce   :  { %978 = vst.msk [vmem:[%s1746_s7 + $0xa8] sm:$0xff] %vm956_vm1, %v1322_v21  ;;  %v918_v23 = vadd.f32 %v1238_v22, %v1577_v6  ;;  %v909_v24 = vpop.f32.mrb[45].mxu0 }
 0x2cf   :  { %v910_v25 = vadd.f32 %v1577_v6, %v909_v24  ;;  %v1239_v26 = vpop.f32.mrb[46].mxu0 }
 0x2d0   :  { %1331 = vtanh.f32 %v918_v23  ;;  %v921_v27 = vadd.f32 %v1239_v26, %v1577_v6  ;;  %v912_v28 = vpop.f32.mrb[47].mxu0 }
 0x2d1   :  { %1333 = vtanh.f32 %v910_v25  ;;  %v913_v29 = vadd.f32 %v1577_v6, %v912_v28 }
 0x2d2   :  { %v1324_v30 = vpop.eup %1323  ;;  %1335 = vtanh.f32 %v921_v27 }
 0x2d3   :  { %v1326_v32 = vpop.eup %1325  ;;  %983 = vst.msk [vmem:[%s1746_s7 + $0xd0] sm:$0xff] %vm956_vm1, %v1324_v30  ;;  %1337 = vtanh.f32 %v913_v29 }
 0x2d4   :  { %v1328_v33 = vpop.eup %1327  ;;  %981 = vst.msk [vmem:[%s1746_s7 + $0xc0] sm:$0xff] %vm956_vm1, %v1326_v32 }
 0x2d5   :  { %v1330_v34 = vpop.eup %1329  ;;  %984 = vst.msk [vmem:[%s1746_s7 + $0xd8] sm:$0xff] %vm956_vm1, %v1328_v33 }
 0x2d6   :  { %982 = vst.msk [vmem:[%s1746_s7 + $0xc8] sm:$0xff] %vm956_vm1, %v1330_v34 }
 0x2da   :  { %v1332_v6 = vpop.eup %1331 }
 0x2db   :  { %v1334_v35 = vpop.eup %1333  ;;  %987 = vst.msk [vmem:[%s1746_s7 + $0xf0] sm:$0xff] %vm956_vm1, %v1332_v6 }
 0x2dc   :  { %v1336_v36 = vpop.eup %1335  ;;  %985 = vst.msk [vmem:[%s1746_s7 + $0xe0] sm:$0xff] %vm956_vm1, %v1334_v35 }
 0x2dd   :  { %v1338_v37 = vpop.eup %1337  ;;  %988 = vst.msk [vmem:[%s1746_s7 + $0xf8] sm:$0xff] %vm956_vm1, %v1336_v36 }
 0x2de   :  { %986 = vst.msk [vmem:[%s1746_s7 + $0xe8] sm:$0xff] %vm956_vm1, %v1338_v37 }

</bundles_post_ra>
